<compile_context>
chip_gen: v7x
topology: tpu7x:2x2x1
jax: 0.10.0
libtpu: 0.0.40
codegen_flags: <defaults>
</compile_context>

<pallas_src>
import functools

import jax
import jax.numpy as jnp
from jax.experimental import pallas as pl
from jax.experimental.pallas import tpu as pltpu


def _unit_kernel(lhs_ref, rhs_ref, red_ref, redt_ref, gamma_ref, beta_ref,
                 o_ref, *, count, eps):
    # lhs_ref   : (Mp, Kpad)  im2col conv LHS; rows = batch*height (zero-padded
    #                         up to a multiple of 8), 3 row-taps folded into K.
    # rhs_ref   : (Kpad, WC)  Toeplitz-structured conv weights.
    # red_ref   : (WC, Cout)  0/1 matrix summing the W positions of a channel.
    # redt_ref  : (Cout, WC)  its transpose (broadcast back to the lane layout).
    # gamma_ref : (1, WC)     BN gamma tiled to the lane-dense (w, c) layout.
    # beta_ref  : (1, WC)     BN beta tiled likewise.
    # o_ref     : (Mp, WC)    BN+ReLU output (padded rows sliced off by caller).

    # ---- conv: one MXU matmul, f32 accumulation.
    y = jnp.dot(lhs_ref[...], rhs_ref[...],
                preferred_element_type=jnp.float32)             # (Mp, WC) f32

    # ---- batch statistics.  Zero-padded rows / K-lanes contribute exactly 0
    # to both sums, so dividing by the true element count is correct.
    s = jnp.sum(y, axis=0, keepdims=True)                       # (1, WC)
    ss = jnp.sum(y * y, axis=0, keepdims=True)                  # (1, WC)
    inv_cnt = 1.0 / count

    # Sum the W positions of each channel and broadcast the per-channel total
    # back onto the lane-dense (w, c) layout with two tiny 0/1 matmuls (no
    # in-kernel relayout of the packed channel dimension).
    mean = jnp.dot(
        jnp.dot(s, red_ref[...], preferred_element_type=jnp.float32),
        redt_ref[...], preferred_element_type=jnp.float32) * inv_cnt
    ex2 = jnp.dot(
        jnp.dot(ss, red_ref[...], preferred_element_type=jnp.float32),
        redt_ref[...], preferred_element_type=jnp.float32) * inv_cnt

    # One-pass biased variance in f32 (fine for zero-mean-ish conv outputs;
    # switch to a shifted/Welford accumulation for tighter tolerances).
    var = ex2 - mean * mean
    scale = gamma_ref[...] * jax.lax.rsqrt(var + eps)
    shift = beta_ref[...] - mean * scale

    # ---- folded BN affine + ReLU, lane-dense unmasked store.
    o_ref[...] = jnp.maximum(y * scale + shift, 0.0)


def _round_up(v, m):
    return (v + m - 1) // m * m


def _prepare_weights(w_oihw, gamma, beta, width, mxu_dtype):
    """Toeplitz conv RHS + BN / reduction constants (hoistable per weight)."""
    Cout, Cin, KH, KW = w_oihw.shape
    assert (KH, KW) == (3, 3), "Unit uses a fixed 3x3 convolution"
    W = width
    Wp2 = W + 2
    Kin = Wp2 * Cin
    K = 3 * Kin
    Kpad = _round_up(K, 128)
    WC = W * Cout

    # rhs[ky*Kin + u*Cin + i, w*Cout + c] = w[c, i, ky, u - w] if 0 <= u-w < 3
    w_t = jnp.transpose(w_oihw, (2, 3, 1, 0)).astype(jnp.float32)   # (ky,kx,i,c)
    sel = (jnp.arange(Wp2)[:, None, None]
           == jnp.arange(W)[None, :, None] + jnp.arange(3)[None, None, :])
    rhs = jnp.einsum('uwx,yxic->yuiwc', sel.astype(jnp.float32), w_t)
    rhs = rhs.reshape(K, WC)
    rhs = jnp.pad(rhs, ((0, Kpad - K), (0, 0))).astype(mxu_dtype)

    # 0/1 channel reduce / broadcast matrices: (WC, Cout) + (Cout, WC)
    # instead of the previous (WC, WC) one-hot aggregation matrix.
    lane_c = jnp.tile(jnp.arange(Cout), W)
    red = (lane_c[:, None] == jnp.arange(Cout)[None, :]).astype(jnp.float32)
    redt = jnp.transpose(red)

    gamma_t = jnp.tile(gamma.astype(jnp.float32), W).reshape(1, WC)
    beta_t = jnp.tile(beta.astype(jnp.float32), W).reshape(1, WC)
    return rhs, red, redt, gamma_t, beta_t, Kpad, WC


@functools.partial(jax.jit, static_argnames=("eps", "mxu_dtype"))
def unit_forward(x_nchw, w_oihw, bias, gamma, beta, eps=1e-5,
                 mxu_dtype=jnp.bfloat16):
    """Conv3x3(pad=1) + BatchNorm2d (training-mode batch stats) + ReLU.  NCHW.

    `bias` is accepted for API parity with nn.Conv2d but not applied: the
    batch-mean subtraction of training-mode BatchNorm cancels it exactly.
    """
    del bias
    N, Cin, H, W = x_nchw.shape
    Cout = w_oihw.shape[0]
    Kin = (W + 2) * Cin
    K = 3 * Kin

    rhs, red, redt, gamma_t, beta_t, Kpad, WC = _prepare_weights(
        w_oihw, gamma, beta, W, mxu_dtype)

    # ---- im2col LHS: NCHW -> NHWC -> zero-pad -> fold the 3 row taps into K.
    # TODO(synk): if the caller can provide / accept NHWC, drop both HBM-level
    # transposes (here and on the output) and keep the lane-dense layout
    # end to end.
    x = jnp.transpose(x_nchw, (0, 2, 3, 1)).astype(jnp.float32)     # (N,H,W,Cin)
    x = jnp.pad(x, ((0, 0), (1, 1), (1, 1), (0, 0)))                # (N,H+2,W+2,Cin)
    x = x.reshape(N, H + 2, Kin)
    lhs = jnp.concatenate([x[:, 0:H], x[:, 1:H + 1], x[:, 2:H + 2]], axis=-1)
    lhs = lhs.reshape(N * H, K)
    Mp = _round_up(N * H, 8)
    lhs = jnp.pad(lhs, ((0, Mp - N * H), (0, Kpad - K))).astype(mxu_dtype)

    kernel = functools.partial(_unit_kernel, count=float(N * H * W),
                               eps=float(eps))

    out = pl.pallas_call(
        kernel,
        out_shape=jax.ShapeDtypeStruct((Mp, WC), jnp.float32),
        grid=(1,),                       # single fused step: conv+stats+BN+ReLU
        in_specs=[
            pl.BlockSpec((Mp, Kpad), lambda i: (0, 0)),
            pl.BlockSpec((Kpad, WC), lambda i: (0, 0)),
            pl.BlockSpec((WC, Cout), lambda i: (0, 0)),
            pl.BlockSpec((Cout, WC), lambda i: (0, 0)),
            pl.BlockSpec((1, WC), lambda i: (0, 0)),
            pl.BlockSpec((1, WC), lambda i: (0, 0)),
        ],
        out_specs=pl.BlockSpec((Mp, WC), lambda i: (0, 0)),
        compiler_params=pltpu.CompilerParams(
            dimension_semantics=("arbitrary",),
            # Explicit VMEM budget: far above this shape's ~200 KiB footprint,
            # above v5e's 16 MiB default scoped limit, and safely below v7x's
            # 64 MiB physical VMEM.
            vmem_limit_bytes=32 * 1024 * 1024,
        ),
    )(lhs, rhs, red, redt, gamma_t, beta_t)

    out = out[:N * H].reshape(N, H, W, Cout)
    return jnp.transpose(out, (0, 3, 1, 2))


def _reference(x_nchw, w_oihw, bias, gamma, beta, eps=1e-5):
    """Plain-JAX reference mirroring the PyTorch module (training-mode BN)."""
    y = jax.lax.conv_general_dilated(
        x_nchw, w_oihw, window_strides=(1, 1), padding=((1, 1), (1, 1)),
        dimension_numbers=("NCHW", "OIHW", "NCHW"))
    y = y + bias[None, :, None, None]
    mean = jnp.mean(y, axis=(0, 2, 3), keepdims=True)
    var = jnp.mean((y - mean) ** 2, axis=(0, 2, 3), keepdims=True)
    y = (y - mean) * jax.lax.rsqrt(var + eps)
    y = y * gamma[None, :, None, None] + beta[None, :, None, None]
    return jnp.maximum(y, 0.0)


if __name__ == "__main__":
    N, Cin, Cout, H, W = 2, 4, 8, 16, 16

    key = jax.random.PRNGKey(0)
    kx, kw, kb, kg, kbeta = jax.random.split(key, 5)

    x = jax.random.normal(kx, (N, Cin, H, W), dtype=jnp.float32)
    w = jax.random.normal(kw, (Cout, Cin, 3, 3), dtype=jnp.float32) * 0.1
    b = jax.random.normal(kb, (Cout,), dtype=jnp.float32) * 0.1
    gamma = 1.0 + 0.1 * jax.random.normal(kg, (Cout,), dtype=jnp.float32)
    beta = 0.1 * jax.random.normal(kbeta, (Cout,), dtype=jnp.float32)

    ref = _reference(x, w, b, gamma, beta)

    # Exact-math path (f32 MXU operands): tight match to the f32 reference.
    out_f32 = jax.block_until_ready(
        unit_forward(x, w, b, gamma, beta, mxu_dtype=jnp.float32))
    assert out_f32.shape == (N, Cout, H, W)
    assert jnp.allclose(out_f32, ref, atol=1e-3, rtol=1e-3), \
        "f32 path mismatch vs reference"

    # Default production path (bf16 MXU operands, f32 accumulate + f32 BN
    # epilogue): identical math up to bf16 operand rounding of x and the
    # conv weights, hence the looser tolerance.
    out_bf16 = jax.block_until_ready(unit_forward(x, w, b, gamma, beta))
    assert out_bf16.shape == (N, Cout, H, W)
    assert jnp.allclose(out_bf16, ref, atol=3e-2, rtol=3e-2), \
        "bf16 path mismatch vs reference"

    print("KERNEL_OK")
</pallas_src>

<mosaic_0001>
module attributes {stable_mosaic.version = 11 : i64} {
  func.func @_unit_kernel(%arg0: i32, %arg1: memref<32x256xf32, #tpu.memory_space<vmem>>, %arg2: memref<256x128xf32, #tpu.memory_space<vmem>>, %arg3: memref<128x8xf32, #tpu.memory_space<vmem>>, %arg4: memref<8x128xf32, #tpu.memory_space<vmem>>, %arg5: memref<1x128xf32, #tpu.memory_space<vmem>>, %arg6: memref<1x128xf32, #tpu.memory_space<vmem>>, %arg7: memref<32x128xf32, #tpu.memory_space<vmem>>) attributes {dimension_semantics = [#tpu.dimension_semantics<arbitrary>], iteration_bounds = array<i64: 1>, scalar_prefetch = 0 : i64, scratch_operands = 0 : i64, tpu.core_type = #tpu.core_type<tc>, window_params = [{pipeline_mode = #tpu.pipeline_mode<synchronous>, transform_indices = @transform_0, window_bounds = array<i64: 32, 256>}, {pipeline_mode = #tpu.pipeline_mode<synchronous>, transform_indices = @transform_1, window_bounds = array<i64: 256, 128>}, {pipeline_mode = #tpu.pipeline_mode<synchronous>, transform_indices = @transform_2, window_bounds = array<i64: 128, 8>}, {pipeline_mode = #tpu.pipeline_mode<synchronous>, transform_indices = @transform_3, window_bounds = array<i64: 8, 128>}, {pipeline_mode = #tpu.pipeline_mode<synchronous>, transform_indices = @transform_4, window_bounds = array<i64: 1, 128>}, {pipeline_mode = #tpu.pipeline_mode<synchronous>, transform_indices = @transform_5, window_bounds = array<i64: 1, 128>}, {pipeline_mode = #tpu.pipeline_mode<synchronous>, transform_indices = @transform_6, window_bounds = array<i64: 32, 128>}]} {
    %c0 = arith.constant 0 : index
    %c0_0 = arith.constant 0 : index
    %0 = vector.load %arg1[%c0, %c0_0] : memref<32x256xf32, #tpu.memory_space<vmem>>, vector<32x256xf32>
    %c0_1 = arith.constant 0 : index
    %c0_2 = arith.constant 0 : index
    %1 = vector.load %arg2[%c0_1, %c0_2] : memref<256x128xf32, #tpu.memory_space<vmem>>, vector<256x128xf32>
    %cst = arith.constant dense<0.000000e+00> : vector<32x128xf32>
    %2 = tpu.matmul %0, %1, %cst {dimension_numbers = #tpu.dot_dimension_numbers<[1], [0], [0], [1], [0, 0, 1, 1], [], []>} : vector<32x256xf32>, vector<256x128xf32>, vector<32x128xf32> -> vector<32x128xf32>
    %cst_3 = arith.constant dense<0.000000e+00> : vector<128xf32>
    %3 = vector.multi_reduction <add>, %2, %cst_3 [0] : vector<32x128xf32> to vector<128xf32>
    %4 = vector.shape_cast %3 : vector<128xf32> to vector<1x128xf32>
    %5 = arith.mulf %2, %2 : vector<32x128xf32>
    %cst_4 = arith.constant dense<0.000000e+00> : vector<128xf32>
    %6 = vector.multi_reduction <add>, %5, %cst_4 [0] : vector<32x128xf32> to vector<128xf32>
    %7 = vector.shape_cast %6 : vector<128xf32> to vector<1x128xf32>
    %c0_5 = arith.constant 0 : index
    %c0_6 = arith.constant 0 : index
    %8 = vector.load %arg3[%c0_5, %c0_6] : memref<128x8xf32, #tpu.memory_space<vmem>>, vector<128x8xf32>
    %cst_7 = arith.constant dense<0.000000e+00> : vector<1x8xf32>
    %9 = tpu.matmul %4, %8, %cst_7 {dimension_numbers = #tpu.dot_dimension_numbers<[1], [0], [0], [1], [0, 0, 1, 1], [], []>} : vector<1x128xf32>, vector<128x8xf32>, vector<1x8xf32> -> vector<1x8xf32>
    %c0_8 = arith.constant 0 : index
    %c0_9 = arith.constant 0 : index
    %10 = vector.load %arg4[%c0_8, %c0_9] : memref<8x128xf32, #tpu.memory_space<vmem>>, vector<8x128xf32>
    %cst_10 = arith.constant dense<0.000000e+00> : vector<1x128xf32>
    %11 = tpu.matmul %9, %10, %cst_10 {dimension_numbers = #tpu.dot_dimension_numbers<[1], [0], [0], [1], [0, 0, 1, 1], [], []>} : vector<1x8xf32>, vector<8x128xf32>, vector<1x128xf32> -> vector<1x128xf32>
    %cst_11 = arith.constant 0.001953125 : f32
    %12 = vector.broadcast %cst_11 : f32 to vector<1x128xf32>
    %13 = arith.mulf %11, %12 : vector<1x128xf32>
    %c0_12 = arith.constant 0 : index
    %c0_13 = arith.constant 0 : index
    %14 = vector.load %arg3[%c0_12, %c0_13] : memref<128x8xf32, #tpu.memory_space<vmem>>, vector<128x8xf32>
    %cst_14 = arith.constant dense<0.000000e+00> : vector<1x8xf32>
    %15 = tpu.matmul %7, %14, %cst_14 {dimension_numbers = #tpu.dot_dimension_numbers<[1], [0], [0], [1], [0, 0, 1, 1], [], []>} : vector<1x128xf32>, vector<128x8xf32>, vector<1x8xf32> -> vector<1x8xf32>
    %c0_15 = arith.constant 0 : index
    %c0_16 = arith.constant 0 : index
    %16 = vector.load %arg4[%c0_15, %c0_16] : memref<8x128xf32, #tpu.memory_space<vmem>>, vector<8x128xf32>
    %cst_17 = arith.constant dense<0.000000e+00> : vector<1x128xf32>
    %17 = tpu.matmul %15, %16, %cst_17 {dimension_numbers = #tpu.dot_dimension_numbers<[1], [0], [0], [1], [0, 0, 1, 1], [], []>} : vector<1x8xf32>, vector<8x128xf32>, vector<1x128xf32> -> vector<1x128xf32>
    %cst_18 = arith.constant 0.001953125 : f32
    %18 = vector.broadcast %cst_18 : f32 to vector<1x128xf32>
    %19 = arith.mulf %17, %18 : vector<1x128xf32>
    %20 = arith.mulf %13, %13 : vector<1x128xf32>
    %21 = arith.subf %19, %20 : vector<1x128xf32>
    %c0_19 = arith.constant 0 : index
    %c0_20 = arith.constant 0 : index
    %22 = vector.load %arg5[%c0_19, %c0_20] : memref<1x128xf32, #tpu.memory_space<vmem>>, vector<1x128xf32>
    %cst_21 = arith.constant 9.99999974E-6 : f32
    %23 = vector.broadcast %cst_21 : f32 to vector<1x128xf32>
    %24 = arith.addf %21, %23 : vector<1x128xf32>
    %25 = math.rsqrt %24 : vector<1x128xf32>
    %26 = arith.mulf %22, %25 : vector<1x128xf32>
    %c0_22 = arith.constant 0 : index
    %c0_23 = arith.constant 0 : index
    %27 = vector.load %arg6[%c0_22, %c0_23] : memref<1x128xf32, #tpu.memory_space<vmem>>, vector<1x128xf32>
    %28 = arith.mulf %13, %26 : vector<1x128xf32>
    %29 = arith.subf %27, %28 : vector<1x128xf32>
    %30 = vector.broadcast %26 : vector<1x128xf32> to vector<32x128xf32>
    %31 = arith.mulf %2, %30 : vector<32x128xf32>
    %32 = vector.broadcast %29 : vector<1x128xf32> to vector<32x128xf32>
    %33 = arith.addf %31, %32 : vector<32x128xf32>
    %cst_24 = arith.constant 0.000000e+00 : f32
    %34 = vector.broadcast %cst_24 : f32 to vector<32x128xf32>
    %35 = arith.maximumf %33, %34 : vector<32x128xf32>
    %c0_25 = arith.constant 0 : index
    %c0_26 = arith.constant 0 : index
    %36 = vector.load %arg7[%c0_25, %c0_26] : memref<32x128xf32, #tpu.memory_space<vmem>>, vector<32x128xf32>
    tpu.vector_store %arg7[%c0_25, %c0_26], %35 {strides = array<i32>} : memref<32x128xf32, #tpu.memory_space<vmem>>, vector<32x128xf32>,
    return
  }
  func.func @transform_0(%arg0: i32) -> (i32, i32) {
    %c0_i32 = arith.constant 0 : i32
    %c0_i32_0 = arith.constant 0 : i32
    %c0_i32_1 = arith.constant 0 : i32
    return %c0_i32, %c0_i32_0 : i32, i32
  }
  func.func @transform_1(%arg0: i32) -> (i32, i32) {
    %c0_i32 = arith.constant 0 : i32
    %c0_i32_0 = arith.constant 0 : i32
    %c0_i32_1 = arith.constant 0 : i32
    return %c0_i32, %c0_i32_0 : i32, i32
  }
  func.func @transform_2(%arg0: i32) -> (i32, i32) {
    %c0_i32 = arith.constant 0 : i32
    %c0_i32_0 = arith.constant 0 : i32
    %c0_i32_1 = arith.constant 0 : i32
    return %c0_i32, %c0_i32_0 : i32, i32
  }
  func.func @transform_3(%arg0: i32) -> (i32, i32) {
    %c0_i32 = arith.constant 0 : i32
    %c0_i32_0 = arith.constant 0 : i32
    %c0_i32_1 = arith.constant 0 : i32
    return %c0_i32, %c0_i32_0 : i32, i32
  }
  func.func @transform_4(%arg0: i32) -> (i32, i32) {
    %c0_i32 = arith.constant 0 : i32
    %c0_i32_0 = arith.constant 0 : i32
    %c0_i32_1 = arith.constant 0 : i32
    return %c0_i32, %c0_i32_0 : i32, i32
  }
  func.func @transform_5(%arg0: i32) -> (i32, i32) {
    %c0_i32 = arith.constant 0 : i32
    %c0_i32_0 = arith.constant 0 : i32
    %c0_i32_1 = arith.constant 0 : i32
    return %c0_i32, %c0_i32_0 : i32, i32
  }
  func.func @transform_6(%arg0: i32) -> (i32, i32) {
    %c0_i32 = arith.constant 0 : i32
    %c0_i32_0 = arith.constant 0 : i32
    %c0_i32_1 = arith.constant 0 : i32
    return %c0_i32, %c0_i32_0 : i32, i32
  }
}

</mosaic_0001>

<bundles_post_ra>
// kernel: eq.22
= control target key start
LH: loop header
LB: loop body
LE: loop exit
PB: predicated region body
PF: predicated region fallthrough
CT: control target
= control target key end

     0   :  { %s131_s10 = smov 120   ;;  %s132_s11 = smov 104   ;;  %vm3_vm0 = vcmask 64512   ;;  %vm9_vm1 = vcmask 1048512   ;;  %vm15_vm2 = vcmask 982912   ;;  %vm21_vm3 = vcmask 917312   ;;  %s207_s0 = inlined_call_operand.vmem [shape: s32[16,8], index: 0, kind: input, shape index: {}]   ;;  %s208_s1 = inlined_call_operand.vmem [shape: s32[128], index: 1, kind: output, shape index: {}]  }
   0x1   :  { %v101_v0 = vld [vmem:[%s207_s0 + $0xf] sm:$0x1]   ;;  %v103_v1 = vld [vmem:[%s207_s0 + $0xd] sm:$0x1]   ;;  %v102_v2 = vld [vmem:[%s207_s0 + $0xe] sm:$0x1]  }
   0x2   :  { %7 = vrot.lane.b32.xlu0 %v101_v0, %s131_s10  ;;  %19 = vrot.lane.b32.xlu1 %v103_v1, %s132_s11  ;;  %v104_v3 = vld [vmem:[%s207_s0 + $0xc] sm:$0x1]   ;;  %s133_s16 = smov 112   ;;  %s134_s17 = smov 96   ;;  %v105_v4 = vld [vmem:[%s207_s0 + $0xb] sm:$0x1]  }
   0x3   :  { %v106_v5 = vld [vmem:[%s207_s0 + $0xa] sm:$0x1]   ;;  %v2_v6 = vld [vmem:[%s207_s0] sm:$0x1]   ;;  %s135_s24 = smov 88   ;;  %s136_s25 = smov 80  }
   0x4   :  { %4 = vst.msk [vmem:[#allocation0] sm:$0x1] %vm3_vm0, %v2_v6   ;;  %v107_v7 = vld [vmem:[%s207_s0 + $0x9] sm:$0x1]   ;;  %v108_v8 = vld [vmem:[%s207_s0 + $0x8] sm:$0x1]  }
   0x5   :  { %s137_s30 = smov 72   ;;  %s138_s2 = smov 64   ;;  %v109_v9 = vld [vmem:[%s207_s0 + $0x7] sm:$0x1]   ;;  %v110_v10 = vld [vmem:[%s207_s0 + $0x6] sm:$0x1]  }
   0x6   :  { %13 = vrot.lane.b32.xlu0 %v102_v2, %s133_s16  ;;  %25 = vrot.lane.b32.xlu1 %v104_v3, %s134_s17  ;;  %s139_s7 = smov 56   ;;  %s140_s8 = smov 48   ;;  %v111_v11 = vld [vmem:[%s207_s0 + $0x5] sm:$0x1]   ;;  %v112_v12 = vld [vmem:[%s207_s0 + $0x4] sm:$0x1]  }
   0x7   :  { %s141_s13 = smov 40   ;;  %s142_s14 = smov 32   ;;  %v113_v13 = vld [vmem:[%s207_s0 + $0x3] sm:$0x1]   ;;  %v114_v14 = vld [vmem:[%s207_s0 + $0x2] sm:$0x1]  }
   0x8   :  { %s143_s19 = smov 24   ;;  %s144_s20 = smov 16   ;;  %v115_v15 = vld [vmem:[%s207_s0 + $0x1] sm:$0x1]   ;;  %vm27_vm4 = vcmask 851712   ;;  %vm33_vm5 = vcmask 786112  }
   0x9   :  { %s145_s0 = smov 8   ;;  %vm39_vm6 = vcmask 720512   ;;  %vm45_vm7 = vcmask 654912   ;;  %vm51_vm8 = vcmask 589312   ;;  %vm57_vm9 = vcmask 523712  }
   0xa   :  { %31 = vrot.lane.b32.xlu0 %v105_v4, %s135_s24  ;;  %37 = vrot.lane.b32.xlu1 %v106_v5, %s136_s25  ;;  %vm63_vm10 = vcmask 458112   ;;  %vm69_vm11 = vcmask 392512   ;;  %vm75_vm12 = vcmask 326912   ;;  %vm81_vm13 = vcmask 261312  }
   0xb   :  { %vm87_vm14 = vcmask 195712   ;;  %vm93_vm15 = vcmask 130112  }
   0xe   :  { %43 = vrot.lane.b32.xlu0 %v107_v7, %s137_s30  ;;  %49 = vrot.lane.b32.xlu1 %v108_v8, %s138_s2 }
  0x12   :  { %55 = vrot.lane.b32.xlu0 %v109_v9, %s139_s7  ;;  %61 = vrot.lane.b32.xlu1 %v110_v10, %s140_s8 }
  0x16   :  { %67 = vrot.lane.b32.xlu0 %v111_v11, %s141_s13  ;;  %73 = vrot.lane.b32.xlu1 %v112_v12, %s142_s14 }
  0x1a   :  { %79 = vrot.lane.b32.xlu0 %v113_v13, %s143_s19  ;;  %85 = vrot.lane.b32.xlu1 %v114_v14, %s144_s20 }
  0x1e   :  { %91 = vrot.lane.b32.xlu0 %v115_v15, %s145_s0 }
  0x74   :  { %v8_v16 = vpop.permute.xlu0 %7   ;;  %v20_v17 = vpop.permute.xlu1 %19  }
  0x75   :  { %10 = vst.msk [vmem:[#allocation0] sm:$0x1] %vm9_vm1, %v8_v16  }
  0x78   :  { %v14_v18 = vpop.permute.xlu0 %13   ;;  %v26_v19 = vpop.permute.xlu1 %25  }
  0x79   :  { %16 = vst.msk [vmem:[#allocation0] sm:$0x1] %vm15_vm2, %v14_v18  }
  0x7a   :  { %22 = vst.msk [vmem:[#allocation0] sm:$0x1] %vm21_vm3, %v20_v17  }
  0x7b   :  { %28 = vst.msk [vmem:[#allocation0] sm:$0x1] %vm27_vm4, %v26_v19  }
  0x7c   :  { %v32_v20 = vpop.permute.xlu0 %31   ;;  %v38_v21 = vpop.permute.xlu1 %37  }
  0x7d   :  { %34 = vst.msk [vmem:[#allocation0] sm:$0x1] %vm33_vm5, %v32_v20  }
  0x7e   :  { %40 = vst.msk [vmem:[#allocation0] sm:$0x1] %vm39_vm6, %v38_v21  }
  0x80   :  { %v44_v22 = vpop.permute.xlu0 %43   ;;  %v50_v23 = vpop.permute.xlu1 %49  }
  0x81   :  { %46 = vst.msk [vmem:[#allocation0] sm:$0x1] %vm45_vm7, %v44_v22  }
  0x82   :  { %52 = vst.msk [vmem:[#allocation0] sm:$0x1] %vm51_vm8, %v50_v23  }
  0x84   :  { %v56_v24 = vpop.permute.xlu0 %55   ;;  %v62_v25 = vpop.permute.xlu1 %61  }
  0x85   :  { %58 = vst.msk [vmem:[#allocation0] sm:$0x1] %vm57_vm9, %v56_v24  }
  0x86   :  { %64 = vst.msk [vmem:[#allocation0] sm:$0x1] %vm63_vm10, %v62_v25  }
  0x88   :  { %v68_v26 = vpop.permute.xlu0 %67   ;;  %v74_v27 = vpop.permute.xlu1 %73  }
  0x89   :  { %70 = vst.msk [vmem:[#allocation0] sm:$0x1] %vm69_vm11, %v68_v26  }
  0x8a   :  { %76 = vst.msk [vmem:[#allocation0] sm:$0x1] %vm75_vm12, %v74_v27  }
  0x8c   :  { %v80_v28 = vpop.permute.xlu0 %79   ;;  %v86_v29 = vpop.permute.xlu1 %85  }
  0x8d   :  { %82 = vst.msk [vmem:[#allocation0] sm:$0x1] %vm81_vm13, %v80_v28  }
  0x8e   :  { %88 = vst.msk [vmem:[#allocation0] sm:$0x1] %vm87_vm14, %v86_v29  }
  0x90   :  { %v92_v30 = vpop.permute.xlu0 %91  }
  0x91   :  { %94 = vst.msk [vmem:[#allocation0] sm:$0x1] %vm93_vm15, %v92_v30  }
  0x98   :  { %v98_v31 = vld [vmem:[#allocation0] sm:$0x1] }
  0x99   :  { %100 = vst [vmem:[%s208_s1] sm:$0x1] %v98_v31 }

// kernel: tile.23
= control target key start
LH: loop header
LB: loop body
LE: loop exit
PB: predicated region body
PF: predicated region fallthrough
CT: control target
= control target key end

     0   :  { %s28_s0 = inlined_call_operand.vmem [shape: f32[8], index: 0, kind: input, shape index: {}]   ;;  %s29_s1 = inlined_call_operand.vmem [shape: f32[16,8], index: 1, kind: output, shape index: {}]  }
   0x1   :  { %v4_v0 = vld [vmem:[%s28_s0] ss:$0 sm:$0xff] }
   0x2   :  { %5 = vst [vmem:[%s29_s1] sm:$0xff] %v4_v0  ;;  %8 = vst [vmem:[%s29_s1 + $0x8] sm:$0xff] %v4_v0 }

// kernel: tile.24
= control target key start
LH: loop header
LB: loop body
LE: loop exit
PB: predicated region body
PF: predicated region fallthrough
CT: control target
= control target key end

     0   :  { %s131_s10 = smov 120   ;;  %s132_s11 = smov 104   ;;  %vm3_vm0 = vcmask 64512   ;;  %vm9_vm1 = vcmask 1048512   ;;  %vm15_vm2 = vcmask 982912   ;;  %vm21_vm3 = vcmask 917312   ;;  %s207_s0 = inlined_call_operand.vmem [shape: f32[16,8], index: 0, kind: input, shape index: {}]   ;;  %s208_s1 = inlined_call_operand.vmem [shape: f32[1,128], index: 1, kind: output, shape index: {}]  }
   0x1   :  { %v101_v0 = vld [vmem:[%s207_s0 + $0xf] sm:$0x1]   ;;  %v103_v1 = vld [vmem:[%s207_s0 + $0xd] sm:$0x1]   ;;  %v102_v2 = vld [vmem:[%s207_s0 + $0xe] sm:$0x1]  }
   0x2   :  { %7 = vrot.lane.b32.xlu0 %v101_v0, %s131_s10  ;;  %19 = vrot.lane.b32.xlu1 %v103_v1, %s132_s11  ;;  %v104_v3 = vld [vmem:[%s207_s0 + $0xc] sm:$0x1]   ;;  %s133_s16 = smov 112   ;;  %s134_s17 = smov 96   ;;  %v105_v4 = vld [vmem:[%s207_s0 + $0xb] sm:$0x1]  }
   0x3   :  { %v106_v5 = vld [vmem:[%s207_s0 + $0xa] sm:$0x1]   ;;  %v2_v6 = vld [vmem:[%s207_s0] sm:$0x1]   ;;  %s135_s24 = smov 88   ;;  %s136_s25 = smov 80  }
   0x4   :  { %4 = vst.msk [vmem:[#allocation0] sm:$0x1] %vm3_vm0, %v2_v6   ;;  %v107_v7 = vld [vmem:[%s207_s0 + $0x9] sm:$0x1]   ;;  %v108_v8 = vld [vmem:[%s207_s0 + $0x8] sm:$0x1]  }
   0x5   :  { %s137_s30 = smov 72   ;;  %s138_s2 = smov 64   ;;  %v109_v9 = vld [vmem:[%s207_s0 + $0x7] sm:$0x1]   ;;  %v110_v10 = vld [vmem:[%s207_s0 + $0x6] sm:$0x1]  }
   0x6   :  { %13 = vrot.lane.b32.xlu0 %v102_v2, %s133_s16  ;;  %25 = vrot.lane.b32.xlu1 %v104_v3, %s134_s17  ;;  %s139_s7 = smov 56   ;;  %s140_s8 = smov 48   ;;  %v111_v11 = vld [vmem:[%s207_s0 + $0x5] sm:$0x1]   ;;  %v112_v12 = vld [vmem:[%s207_s0 + $0x4] sm:$0x1]  }
   0x7   :  { %s141_s13 = smov 40   ;;  %s142_s14 = smov 32   ;;  %v113_v13 = vld [vmem:[%s207_s0 + $0x3] sm:$0x1]   ;;  %v114_v14 = vld [vmem:[%s207_s0 + $0x2] sm:$0x1]  }
   0x8   :  { %s143_s19 = smov 24   ;;  %s144_s20 = smov 16   ;;  %v115_v15 = vld [vmem:[%s207_s0 + $0x1] sm:$0x1]   ;;  %vm27_vm4 = vcmask 851712   ;;  %vm33_vm5 = vcmask 786112  }
   0x9   :  { %s145_s0 = smov 8   ;;  %vm39_vm6 = vcmask 720512   ;;  %vm45_vm7 = vcmask 654912   ;;  %vm51_vm8 = vcmask 589312   ;;  %vm57_vm9 = vcmask 523712  }
   0xa   :  { %31 = vrot.lane.b32.xlu0 %v105_v4, %s135_s24  ;;  %37 = vrot.lane.b32.xlu1 %v106_v5, %s136_s25  ;;  %vm63_vm10 = vcmask 458112   ;;  %vm69_vm11 = vcmask 392512   ;;  %vm75_vm12 = vcmask 326912   ;;  %vm81_vm13 = vcmask 261312  }
   0xb   :  { %vm87_vm14 = vcmask 195712   ;;  %vm93_vm15 = vcmask 130112  }
   0xe   :  { %43 = vrot.lane.b32.xlu0 %v107_v7, %s137_s30  ;;  %49 = vrot.lane.b32.xlu1 %v108_v8, %s138_s2 }
  0x12   :  { %55 = vrot.lane.b32.xlu0 %v109_v9, %s139_s7  ;;  %61 = vrot.lane.b32.xlu1 %v110_v10, %s140_s8 }
  0x16   :  { %67 = vrot.lane.b32.xlu0 %v111_v11, %s141_s13  ;;  %73 = vrot.lane.b32.xlu1 %v112_v12, %s142_s14 }
  0x1a   :  { %79 = vrot.lane.b32.xlu0 %v113_v13, %s143_s19  ;;  %85 = vrot.lane.b32.xlu1 %v114_v14, %s144_s20 }
  0x1e   :  { %91 = vrot.lane.b32.xlu0 %v115_v15, %s145_s0 }
  0x74   :  { %v8_v16 = vpop.permute.xlu0 %7   ;;  %v20_v17 = vpop.permute.xlu1 %19  }
  0x75   :  { %10 = vst.msk [vmem:[#allocation0] sm:$0x1] %vm9_vm1, %v8_v16  }
  0x78   :  { %v14_v18 = vpop.permute.xlu0 %13   ;;  %v26_v19 = vpop.permute.xlu1 %25  }
  0x79   :  { %16 = vst.msk [vmem:[#allocation0] sm:$0x1] %vm15_vm2, %v14_v18  }
  0x7a   :  { %22 = vst.msk [vmem:[#allocation0] sm:$0x1] %vm21_vm3, %v20_v17  }
  0x7b   :  { %28 = vst.msk [vmem:[#allocation0] sm:$0x1] %vm27_vm4, %v26_v19  }
  0x7c   :  { %v32_v20 = vpop.permute.xlu0 %31   ;;  %v38_v21 = vpop.permute.xlu1 %37  }
  0x7d   :  { %34 = vst.msk [vmem:[#allocation0] sm:$0x1] %vm33_vm5, %v32_v20  }
  0x7e   :  { %40 = vst.msk [vmem:[#allocation0] sm:$0x1] %vm39_vm6, %v38_v21  }
  0x80   :  { %v44_v22 = vpop.permute.xlu0 %43   ;;  %v50_v23 = vpop.permute.xlu1 %49  }
  0x81   :  { %46 = vst.msk [vmem:[#allocation0] sm:$0x1] %vm45_vm7, %v44_v22  }
  0x82   :  { %52 = vst.msk [vmem:[#allocation0] sm:$0x1] %vm51_vm8, %v50_v23  }
  0x84   :  { %v56_v24 = vpop.permute.xlu0 %55   ;;  %v62_v25 = vpop.permute.xlu1 %61  }
  0x85   :  { %58 = vst.msk [vmem:[#allocation0] sm:$0x1] %vm57_vm9, %v56_v24  }
  0x86   :  { %64 = vst.msk [vmem:[#allocation0] sm:$0x1] %vm63_vm10, %v62_v25  }
  0x88   :  { %v68_v26 = vpop.permute.xlu0 %67   ;;  %v74_v27 = vpop.permute.xlu1 %73  }
  0x89   :  { %70 = vst.msk [vmem:[#allocation0] sm:$0x1] %vm69_vm11, %v68_v26  }
  0x8a   :  { %76 = vst.msk [vmem:[#allocation0] sm:$0x1] %vm75_vm12, %v74_v27  }
  0x8c   :  { %v80_v28 = vpop.permute.xlu0 %79   ;;  %v86_v29 = vpop.permute.xlu1 %85  }
  0x8d   :  { %82 = vst.msk [vmem:[#allocation0] sm:$0x1] %vm81_vm13, %v80_v28  }
  0x8e   :  { %88 = vst.msk [vmem:[#allocation0] sm:$0x1] %vm87_vm14, %v86_v29  }
  0x90   :  { %v92_v30 = vpop.permute.xlu0 %91  }
  0x91   :  { %94 = vst.msk [vmem:[#allocation0] sm:$0x1] %vm93_vm15, %v92_v30  }
  0x98   :  { %v98_v31 = vld [vmem:[#allocation0] sm:$0x1] }
  0x99   :  { %100 = vst [vmem:[%s208_s1] sm:$0x1] %v98_v31 }

// kernel: unit_forward.1
= control target key start
LH: loop header
LB: loop body
LE: loop exit
PB: predicated region body
PF: predicated region fallthrough
CT: control target
= control target key end

     0   :  { %v766_v3 = vmov 0.0|0.0   ;;  %vm767_vm0 = vmmov 0   ;;  %vm257_vm1 = vcmask 64512   ;;  %s1031_s1 = inlined_call_operand.vmem [shape: f32[256,128], index: 1, kind: input, shape index: {}]   ;;  %s1032_s0 = inlined_call_operand.vmem [shape: f32[32,256], index: 0, kind: input, shape index: {}]   ;;  %s1033_s2 = inlined_call_operand.vmem [shape: f32[128,8], index: 2, kind: input, shape index: {}]   ;;  %s1034_s3 = inlined_call_operand.vmem [shape: f32[8,128], index: 3, kind: input, shape index: {}]   ;;  %s1035_s4 = inlined_call_operand.vmem [shape: f32[1,128], index: 4, kind: input, shape index: {}]   ;;  %s1036_s5 = inlined_call_operand.vmem [shape: f32[1,128], index: 5, kind: input, shape index: {}]   ;;  %s1037_s6 = inlined_call_operand.vmem [shape: f32[32,128], index: 6, kind: output, shape index: {}]  }
   0x1   :  { %v47_v0 = vld [vmem:[%s1031_s1 + $0x80] sm:$0xff]  ;;  %v48_v1 = vld [vmem:[%s1031_s1 + $0x88] sm:$0xff]  ;;  %713 = vmatprep.subr.bf16.mxu1 %v766_v3  ;;  %v49_v6 = vld [vmem:[%s1031_s1 + $0x90] sm:$0xff] }
   0x2   :  { %v31_v2 = vld [vmem:[%s1031_s1] sm:$0xff]  ;;  %v681_v4 = vpack.c.bf16 %v48_v1, %v47_v0  ;;  %v32_v5 = vld [vmem:[%s1031_s1 + $0x8] sm:$0xff]  ;;  %v50_v7 = vld [vmem:[%s1031_s1 + $0x98] sm:$0xff] }
   0x3   :  { %v683_v8 = vpack.c.bf16 %v32_v5, %v31_v2  ;;  %v685_v9 = vpack.c.bf16 %v50_v7, %v49_v6  ;;  %v33_v10 = vld [vmem:[%s1031_s1 + $0x10] sm:$0xff]  ;;  %v34_v11 = vld [vmem:[%s1031_s1 + $0x18] sm:$0xff]  ;;  %v51_v12 = vld [vmem:[%s1031_s1 + $0xa0] sm:$0xff] }
   0x4   :  { %682 = vmatprep.subr.bf16.mxu0 %v681_v4  ;;  %v52_v13 = vld [vmem:[%s1031_s1 + $0xa8] sm:$0xff]  ;;  %v687_v14 = vpack.c.bf16 %v34_v11, %v33_v10  ;;  %v35_v16 = vld [vmem:[%s1031_s1 + $0x20] sm:$0xff]  ;;  %v53_v18 = vld [vmem:[%s1031_s1 + $0xb0] sm:$0xff] }
   0x5   :  { %684 = vmatpush3.bf16.msra.mxu0 %v683_v8  ;;  %v689_v15 = vpack.c.bf16 %v52_v13, %v51_v12  ;;  %v36_v17 = vld [vmem:[%s1031_s1 + $0x28] sm:$0xff]  ;;  %v54_v19 = vld [vmem:[%s1031_s1 + $0xb8] sm:$0xff]  ;;  %v37_v22 = vld [vmem:[%s1031_s1 + $0x30] sm:$0xff] }
   0x6   :  { %686 = vmatprep.subr.bf16.mxu0 %v685_v9  ;;  %v691_v20 = vpack.c.bf16 %v36_v17, %v35_v16  ;;  %v693_v21 = vpack.c.bf16 %v54_v19, %v53_v18  ;;  %v38_v23 = vld [vmem:[%s1031_s1 + $0x38] sm:$0xff]  ;;  %v55_v24 = vld [vmem:[%s1031_s1 + $0xc0] sm:$0xff]  ;;  %v56_v25 = vld [vmem:[%s1031_s1 + $0xc8] sm:$0xff]  ;;  %v768_v18 = vmov 0.0  }
   0x7   :  { %v24_v26 = vld [vmem:[%s1032_s0 + $0x8] sm:$0xff]  ;;  %v695_v27 = vpack.c.bf16 %v38_v23, %v37_v22  ;;  %v39_v28 = vld [vmem:[%s1031_s1 + $0x40] sm:$0xff]  ;;  %v697_v29 = vpack.c.bf16 %v56_v25, %v55_v24  ;;  %v57_v33 = vld [vmem:[%s1031_s1 + $0xd0] sm:$0xff]  ;;  %633 = vmatprep.mubr.msk.f32.mxu1 %vm767_vm0, %v768_v18 }
   0x8   :  { %127 = vmatprep.mubr.f32.mxu0 %v24_v26  ;;  %v40_v30 = vld [vmem:[%s1031_s1 + $0x48] sm:$0xff]  ;;  %v170_v31 = vld [vmem:[%s1033_s2] sm:$0xff]  ;;  %v58_v34 = vld [vmem:[%s1031_s1 + $0xd8] sm:$0xff] }
   0x9   :  { %688 = vmatpush3.bf16.msra.mxu0 %v687_v14  ;;  %v171_v32 = vld [vmem:[%s1033_s2 + $0x8] sm:$0xff]  ;;  %v699_v36 = vpack.c.bf16 %v40_v30, %v39_v28  ;;  %v701_v37 = vpack.c.bf16 %v58_v34, %v57_v33  ;;  %v41_v38 = vld [vmem:[%s1031_s1 + $0x50] sm:$0xff]  ;;  %v42_v39 = vld [vmem:[%s1031_s1 + $0x58] sm:$0xff] }
   0xa   :  { %690 = vmatprep.subr.bf16.mxu0 %v689_v15  ;;  %v714_v35 = vpack.c.bf16 %v171_v32, %v170_v31  ;;  %v59_v40 = vld [vmem:[%s1031_s1 + $0xe0] sm:$0xff]  ;;  %v60_v41 = vld [vmem:[%s1031_s1 + $0xe8] sm:$0xff]  ;;  %v703_v42 = vpack.c.bf16 %v42_v39, %v41_v38  ;;  %v61_v46 = vld [vmem:[%s1031_s1 + $0xf0] sm:$0xff] }
   0xb   :  { %v705_v43 = vpack.c.bf16 %v60_v41, %v59_v40  ;;  %v43_v44 = vld [vmem:[%s1031_s1 + $0x60] sm:$0xff]  ;;  %v44_v45 = vld [vmem:[%s1031_s1 + $0x68] sm:$0xff]  ;;  %v62_v47 = vld [vmem:[%s1031_s1 + $0xf8] sm:$0xff] }
   0xc   :  { %715 = vmatpush3.bf16.msra.mxu1 %v714_v35  ;;  %v707_v48 = vpack.c.bf16 %v44_v45, %v43_v44  ;;  %v709_v49 = vpack.c.bf16 %v62_v47, %v61_v46  ;;  %v45_v50 = vld [vmem:[%s1031_s1 + $0x70] sm:$0xff]  ;;  %v46_v51 = vld [vmem:[%s1031_s1 + $0x78] sm:$0xff]  ;;  %v23_v53 = vld [vmem:[%s1032_s0] sm:$0xff] }
   0xd   :  { %692 = vmatpush3.bf16.msra.mxu0 %v691_v20  ;;  %716 = vmatprep.subr.bf16.mxu1 %v766_v3  ;;  %v711_v52 = vpack.c.bf16 %v46_v51, %v45_v50  ;;  %v26_v54 = vld [vmem:[%s1032_s0 + $0x18] sm:$0xff]  ;;  %v25_v55 = vld [vmem:[%s1032_s0 + $0x10] sm:$0xff]  ;;  %v28_v56 = vld [vmem:[%s1032_s0 + $0x28] sm:$0xff] }
   0xe   :  { %694 = vmatprep.subr.bf16.mxu0 %v693_v21  ;;  %v27_v57 = vld [vmem:[%s1032_s0 + $0x20] sm:$0xff]  ;;  %v30_v58 = vld [vmem:[%s1032_s0 + $0x38] sm:$0xff]  ;;  %v29_v59 = vld [vmem:[%s1032_s0 + $0x30] sm:$0xff] }
   0xf   :  { %v172_v60 = vld [vmem:[%s1033_s2 + $0x10] sm:$0xff]  ;;  %v173_v61 = vld [vmem:[%s1033_s2 + $0x18] sm:$0xff]  ;;  %v174_v63 = vld [vmem:[%s1033_s2 + $0x20] sm:$0xff] }
  0x10   :  { %v717_v62 = vpack.c.bf16 %v173_v61, %v172_v60  ;;  %v175_v0 = vld [vmem:[%s1033_s2 + $0x28] sm:$0xff]  ;;  %v176_v2 = vld [vmem:[%s1033_s2 + $0x30] sm:$0xff]  ;;  %v177_v4 = vld [vmem:[%s1033_s2 + $0x38] sm:$0xff] }
  0x11   :  { %696 = vmatpush3.bf16.msra.mxu0 %v695_v27  ;;  %v720_v1 = vpack.c.bf16 %v175_v0, %v174_v63  ;;  %v723_v5 = vpack.c.bf16 %v177_v4, %v176_v2  ;;  %v178_v6 = vld [vmem:[%s1033_s2 + $0x40] sm:$0xff]  ;;  %v179_v7 = vld [vmem:[%s1033_s2 + $0x48] sm:$0xff]  ;;  %v180_v9 = vld [vmem:[%s1033_s2 + $0x50] sm:$0xff]  ;;  %v486_v2 = vlaneseq }
  0x12   :  { %698 = vmatprep.subr.bf16.mxu0 %v697_v29  ;;  %718 = vmatpush3.bf16.msra.mxu1 %v717_v62  ;;  %v726_v8 = vpack.c.bf16 %v179_v7, %v178_v6  ;;  %v181_v10 = vld [vmem:[%s1033_s2 + $0x58] sm:$0xff]  ;;  %v182_v12 = vld [vmem:[%s1033_s2 + $0x60] sm:$0xff]  ;;  %v183_v13 = vld [vmem:[%s1033_s2 + $0x68] sm:$0xff] }
  0x13   :  { %719 = vmatprep.subr.bf16.mxu1 %v766_v3  ;;  %v729_v11 = vpack.c.bf16 %v181_v10, %v180_v9  ;;  %v732_v14 = vpack.c.bf16 %v183_v13, %v182_v12  ;;  %v184_v15 = vld [vmem:[%s1033_s2 + $0x70] sm:$0xff]  ;;  %v185_v16 = vld [vmem:[%s1033_s2 + $0x78] sm:$0xff]  ;;  %v256_v51 = vld [vmem:[%s1034_s3] sm:$0xff]  ;;  %v487_v4 = vshrl.u32 %v486_v2, 7 }
  0x14   :  { %v735_v17 = vpack.c.bf16 %v185_v16, %v184_v15  ;;  %v482_v9 = vld [vmem:[%s1036_s5] sm:$0x1] }
  0x15   :  { %700 = vmatpush3.bf16.msra.mxu0 %v699_v36  ;;  %v488_v6 = vsub.s32 0, %v487_v4 }
  0x16   :  { %702 = vmatprep.subr.bf16.mxu0 %v701_v37  ;;  %721 = vmatpush3.bf16.msra.mxu1 %v720_v1 }
  0x17   :  { %722 = vmatprep.subr.bf16.mxu1 %v766_v3 }
  0x19   :  { %704 = vmatpush3.bf16.msra.mxu0 %v703_v42 }
  0x1a   :  { %706 = vmatprep.subr.bf16.mxu0 %v705_v43  ;;  %724 = vmatpush3.bf16.msra.mxu1 %v723_v5 }
  0x1b   :  { %725 = vmatprep.subr.bf16.mxu1 %v766_v3 }
  0x1d   :  { %708 = vmatpush3.bf16.msra.mxu0 %v707_v48 }
  0x1e   :  { %710 = vmatprep.subr.bf16.mxu0 %v709_v49  ;;  %727 = vmatpush3.bf16.msra.mxu1 %v726_v8 }
  0x1f   :  { %728 = vmatprep.subr.bf16.mxu1 %v766_v3 }
  0x21   :  { %712 = vmatpush3.bf16.msra.mxu0 %v711_v52 }
  0x22   :  { %737 = vmatprep.subr.bf16.mxu0 %v766_v3  ;;  %730 = vmatpush3.bf16.msra.mxu1 %v729_v11 }
  0x23   :  { %731 = vmatprep.subr.bf16.mxu1 %v766_v3 }
  0x24   :  { %128 = vmatmul.mubr.f32.vlgmr.msra.gmra.mrb[0].mxu0 %v23_v53 }
  0x25   :  { %132 = vmatprep.mubr.f32.mxu0 %v26_v54  ;;  %739 = vmatpush3.bf16.msra.mxu0 %v714_v35 }
  0x26   :  { %740 = vmatprep.subr.bf16.mxu0 %v766_v3  ;;  %733 = vmatpush3.bf16.msra.mxu1 %v732_v14 }
  0x27   :  { %734 = vmatprep.subr.bf16.mxu1 %v766_v3 }
  0x28   :  { %133 = vmatmul.mubr.f32.gmra.mrb[2].mxu0 %v25_v55 }
  0x29   :  { %137 = vmatprep.mubr.f32.mxu0 %v28_v56  ;;  %742 = vmatpush3.bf16.msra.mxu0 %v717_v62 }
  0x2a   :  { %743 = vmatprep.subr.bf16.mxu0 %v766_v3  ;;  %736 = vmatpush3.bf16.msra.mxu1 %v735_v17 }
  0x2b   :  { %636 = vmatprep.subr.mxu1 %v768_v18 }
  0x2c   :  { %138 = vmatmul.mubr.f32.gmra.mrb[4].mxu0 %v27_v57 }
  0x2d   :  { %142 = vmatprep.mubr.f32.mxu0 %v30_v58  ;;  %745 = vmatpush3.bf16.msra.mxu0 %v720_v1 }
  0x2e   :  { %746 = vmatprep.subr.bf16.mxu0 %v766_v3 }
  0x30   :  { %143 = vmatmul.mubr.f32.gmra.mrb[6].mxu0 %v29_v59 }
  0x31   :  { %748 = vmatpush3.bf16.msra.mxu0 %v723_v5  ;;  %673 = vmatprep.mubr.msk.f32.mxu0 %vm767_vm0, %v768_v18  ;;  %v478_v5 = vld [vmem:[%s1035_s4] sm:$0x1] }
  0x32   :  { %749 = vmatprep.subr.bf16.mxu0 %v766_v3 }
  0x35   :  { %751 = vmatpush3.bf16.msra.mxu0 %v726_v8 }
  0x36   :  { %752 = vmatprep.subr.bf16.mxu0 %v766_v3 }
  0x39   :  { %754 = vmatpush3.bf16.msra.mxu0 %v729_v11 }
  0x3a   :  { %755 = vmatprep.subr.bf16.mxu0 %v766_v3 }
  0x3d   :  { %757 = vmatpush3.bf16.msra.mxu0 %v732_v14 }
  0x3e   :  { %758 = vmatprep.subr.bf16.mxu0 %v766_v3 }
  0x41   :  { %760 = vmatpush3.bf16.msra.mxu0 %v735_v17 }
  0xf7   :  { %v551_v19 = vpop.f32.mrb[0].mxu0 }
  0xf8   :  { %v552_v20 = vpop.f32.mrb[1].mxu0 }
  0xf9   :  { %v990_v21 = vadd.f32 %v552_v20, %v551_v19 }
  0xfb   :  { %v554_v22 = vpop.f32.mrb[2].mxu0  ;;  %v157_v28 = vmul.f32 %v990_v21, %v990_v21 }
  0xfc   :  { %v555_v23 = vpop.f32.mrb[3].mxu0 }
  0xfd   :  { %v992_v24 = vadd.f32 %v555_v23, %v554_v22 }
  0xff   :  { %v557_v25 = vpop.f32.mrb[4].mxu0  ;;  %v158_v26 = vmul.f32 %v992_v24, %v992_v24  ;;  %v148_v29 = vadd.f32 %v992_v24, %v990_v21 }
 0x100   :  { %v558_v3 = vpop.f32.mrb[5].mxu0 }
 0x101   :  { %v996_v27 = vadd.f32 %v558_v3, %v557_v25  ;;  %v161_v33 = vadd.f32 %v158_v26, %v157_v28 }
 0x103   :  { %v159_v30 = vmul.f32 %v996_v27, %v996_v27  ;;  %v560_v31 = vpop.f32.mrb[6].mxu0  ;;  %v149_v34 = vadd.f32 %v996_v27, %v148_v29 }
 0x104   :  { %v561_v32 = vpop.f32.mrb[7].mxu0 }
 0x105   :  { %v562_v35 = vadd.f32 %v561_v32, %v560_v31  ;;  %v162_v36 = vadd.f32 %v161_v33, %v159_v30 }
 0x107   :  { %v150_v37 = vadd.f32 %v562_v35, %v149_v34  ;;  %v160_v38 = vmul.f32 %v562_v35, %v562_v35 }
 0x109   :  { %v151_v39 = vrot.slane %v150_v37, 4  ;;  %v163_v40 = vadd.f32 %v162_v36, %v160_v38 }
 0x10b   :  { %v152_v41 = vadd.f32 %v151_v39, %v150_v37  ;;  %v164_v42 = vrot.slane %v163_v40, 4 }
 0x10d   :  { %v165_v43 = vadd.f32 %v164_v42, %v163_v40  ;;  %v153_v44 = vrot.slane %v152_v41, 2 }
 0x10f   :  { %v166_v45 = vrot.slane %v165_v43, 2  ;;  %v154_v46 = vadd.f32 %v153_v44, %v152_v41 }
 0x111   :  { %v167_v47 = vadd.f32 %v166_v45, %v165_v43  ;;  %v155_v48 = vrot.slane %v154_v46, 1 }
 0x113   :  { %v168_v49 = vrot.slane %v167_v47, 1  ;;  %v156_v50 = vadd.f32 %v155_v48, %v154_v46 }
 0x115   :  { %634 = vmatmul.mubr.f32.vlgmr.msra.gmra.mrb[0].mxu1 %v156_v50  ;;  %v169_v52 = vadd.f32 %v168_v49, %v167_v47 }
 0x116   :  { %637 = vmatpush3.msra.mxu1 %v256_v51  ;;  %638 = vmatprep.mubr.msk.f32.mxu1 %vm767_vm0, %v768_v18 }
 0x117   :  { %674 = vmatmul.mubr.f32.vlgmr.msra.gmra.mrb[8].mxu0 %v169_v52  ;;  %676 = vmatprep.subr.mxu1 %v768_v18 }
 0x1e8   :  { %v252_v53 = vpop.f32.mrb[0].mxu1 }
 0x1e9   :  { %v635_v54 = vpop.f32.mrb[1].mxu1  ;;  %639 = vmatmul.mubr.msk.f32.vlgmr.msra.gmra.mrb[2].mxu1 %vm257_vm1, %v252_v53 }
 0x1ea   :  { %677 = vmatpush3.msra.mxu1 %v256_v51  ;;  %v398_v55 = vpop.f32.mrb[8].mxu0  ;;  %678 = vmatprep.mubr.msk.f32.mxu1 %vm767_vm0, %v768_v18 }
 0x1eb   :  { %v675_v56 = vpop.f32.mrb[9].mxu0 }
 0x1ed   :  { %679 = vmatmul.mubr.msk.f32.vlgmr.msra.gmra.mrb[4].mxu1 %vm257_vm1, %v398_v55 }
 0x2bc   :  { %v327_v57 = vpop.f32.mrb[2].mxu1 }
 0x2bd   :  { %v331_v58 = vmul.f32 0.001953125, %v327_v57  ;;  %v640_v59 = vpop.f32.mrb[3].mxu1 }
 0x2bf   :  { %v476_v61 = vmul.f32 %v331_v58, %v331_v58 }
 0x2c0   :  { %v471_v60 = vpop.f32.mrb[4].mxu1 }
 0x2c1   :  { %v475_v62 = vmul.f32 0.001953125, %v471_v60  ;;  %v680_v63 = vpop.f32.mrb[5].mxu1 }
 0x2c3   :  { %v477_v0 = vsub.f32 %v475_v62, %v476_v61 }
 0x2c5   :  { %v479_v1 = vadd.f32 1e-05, %v477_v0 }
 0x2c7   :  { %764 = vrsqrt.f32 %v479_v1 }
 0x2d1   :  { %v765_v7 = vpop.eup %764 }
 0x2d2   :  { %v481_v8 = vmul.f32 %v765_v7, %v478_v5 }
 0x2d4   :  { %v483_v10 = vmul.f32 %v481_v8, %v331_v58  ;;  %v489_v11 = vrot.slane %v481_v8, %v488_v6 }
 0x2d6   :  { %v484_v12 = vsub.f32 %v482_v9, %v483_v10  ;;  %v491_v13 = vmul.f32 %v990_v21, %v489_v11  ;;  %v492_v14 = vmul.f32 %v992_v24, %v489_v11  ;;  %v493_v15 = vmul.f32 %v996_v27, %v489_v11 }
 0x2d7   :  { %v494_v16 = vmul.f32 %v562_v35, %v489_v11 }
 0x2d8   :  { %v499_v17 = vrot.slane %v484_v12, %v488_v6 }
 0x2da   :  { %v501_v18 = vadd.f32 %v499_v17, %v491_v13  ;;  %v502_v19 = vadd.f32 %v499_v17, %v492_v14  ;;  %v503_v20 = vadd.f32 %v499_v17, %v493_v15  ;;  %v504_v22 = vadd.f32 %v499_v17, %v494_v16 }
 0x2dc   :  { %v505_v23 = vmax.f32 %v501_v18, 0.0  ;;  %v506_v25 = vmax.f32 %v502_v19, 0.0  ;;  %v507_v3 = vmax.f32 %v503_v20, 0.0  ;;  %v508_v26 = vmax.f32 %v504_v22, 0.0 }
 0x2de   :  { %509 = vst [vmem:[%s1037_s6] sm:$0xff] %v505_v23  ;;  %510 = vst [vmem:[%s1037_s6 + $0x8] sm:$0xff] %v506_v25 }
 0x2df   :  { %511 = vst [vmem:[%s1037_s6 + $0x10] sm:$0xff] %v507_v3  ;;  %512 = vst [vmem:[%s1037_s6 + $0x18] sm:$0xff] %v508_v26 }

</bundles_post_ra>
